<compile_context>
chip_gen: v7x
topology: tpu7x:2x2x1
jax: 0.10.0
libtpu: 0.0.40
codegen_flags: <defaults>
</compile_context>

<pallas_src>
import jax
import jax.numpy as jnp
from jax.experimental import pallas as pl
from jax.experimental.pallas import tpu as pltpu

H1, H2, OUT = 400, 200, 1          # logical feature sizes (PyTorch module)
H1P, H2P, OUTP = 512, 256, 128     # lane-padded feature sizes (multiples of 128)
_LANE = 128
_SUBLANE = 8


def _round_up(n, m):
    return (n + m - 1) // m * m


def _leaky_relu(x, slope=0.2):
    return jnp.where(x > 0, x, slope * x)


def discriminator_kernel(x_ref, w1_ref, b1_ref, w2_ref, b2_ref, w3_ref, b3_ref, o_ref):
    """Fused 3-layer MLP: bf16 MXU matmuls with f32 accumulation, f32 elementwise."""
    x = x_ref[...]  # (TB, Kp) bf16

    h1 = jnp.dot(x, w1_ref[...], preferred_element_type=jnp.float32) + b1_ref[...]
    h1 = _leaky_relu(h1)

    h2 = jnp.dot(h1.astype(jnp.bfloat16), w2_ref[...],
                 preferred_element_type=jnp.float32) + b2_ref[...]
    h2 = _leaky_relu(h2)

    h3 = jnp.dot(h2.astype(jnp.bfloat16), w3_ref[...],
                 preferred_element_type=jnp.float32) + b3_ref[...]

    # exp / reciprocal go to the (otherwise idle) EUP slot.
    o_ref[...] = jax.nn.sigmoid(h3)


def discriminator_forward(x, padded_params, *, block_b=256):
    """x: (B, image_size) f32.  Returns (B, 1) f32 sigmoid outputs."""
    w1, b1, w2, b2, w3, b3 = padded_params
    B, K = x.shape
    Kp = w1.shape[0]

    # Batch tile: large when possible, otherwise rounded up to the sublane width.
    tb = min(block_b, _round_up(B, _SUBLANE))
    Bp = _round_up(B, tb)

    # Zero-pad batch rows and feature columns; cast activations to bf16 for the MXU.
    x_p = jnp.zeros((Bp, Kp), jnp.bfloat16).at[:B, :K].set(x.astype(jnp.bfloat16))

    const = lambda a: pl.BlockSpec(a.shape, lambda i: (0,) * a.ndim)  # VMEM-resident

    out_padded = pl.pallas_call(
        discriminator_kernel,
        out_shape=jax.ShapeDtypeStruct((Bp, OUTP), jnp.float32),
        grid=(Bp // tb,),
        in_specs=[
            pl.BlockSpec((tb, Kp), lambda i: (i, 0)),   # activations: tiled over batch
            const(w1), const(b1),
            const(w2), const(b2),
            const(w3), const(b3),
        ],
        out_specs=pl.BlockSpec((tb, OUTP), lambda i: (i, 0)),
        compiler_params=pltpu.CompilerParams(
            dimension_semantics=("parallel",),
            vmem_limit_bytes=64 << 20,
        ),
    )(x_p, w1, b1, w2, b2, w3, b3)

    # Slice back to the real (B, 1) output.
    return out_padded[:B, :OUT]


def init_params(key, image_size):
    """nn.Linear-style init U(-1/sqrt(fan_in), 1/sqrt(fan_in)); logical (unpadded) f32 shapes."""
    dims = [(image_size, H1), (H1, H2), (H2, OUT)]
    params = []
    for fin, fout in dims:
        kw, kb, key = jax.random.split(key, 3)
        bound = 1.0 / jnp.sqrt(fin)
        w = jax.random.uniform(kw, (fin, fout), jnp.float32, -bound, bound)
        b = jax.random.uniform(kb, (1, fout), jnp.float32, -bound, bound)
        params += [w, b]
    return tuple(params)


def pad_params(params, image_size):
    """Zero-pad feature dims to lane multiples; weights in bf16 (MXU), biases in f32."""
    w1, b1, w2, b2, w3, b3 = params
    Kp = _round_up(image_size, _LANE)

    def pad_w(w, rows, cols):
        out = jnp.zeros((rows, cols), jnp.bfloat16)
        return out.at[: w.shape[0], : w.shape[1]].set(w.astype(jnp.bfloat16))

    def pad_b(b, cols):
        return jnp.zeros((1, cols), jnp.float32).at[:, : b.shape[1]].set(b)

    return (pad_w(w1, Kp, H1P), pad_b(b1, H1P),
            pad_w(w2, H1P, H2P), pad_b(b2, H2P),
            pad_w(w3, H2P, OUTP), pad_b(b3, OUTP))


def reference_forward(x, params):
    """Pure-f32 JAX reference matching the PyTorch module semantics."""
    w1, b1, w2, b2, w3, b3 = params
    h = jax.nn.leaky_relu(x @ w1 + b1, 0.2)
    h = jax.nn.leaky_relu(h @ w2 + b2, 0.2)
    return jax.nn.sigmoid(h @ w3 + b3)


def reference_forward_bf16(x, params):
    """Reference mirroring the kernel's bf16-input / f32-accumulate matmuls."""
    w1, b1, w2, b2, w3, b3 = params
    dot = lambda a, b: jnp.dot(a.astype(jnp.bfloat16), b.astype(jnp.bfloat16),
                               preferred_element_type=jnp.float32)
    h = jax.nn.leaky_relu(dot(x, w1) + b1, 0.2)
    h = jax.nn.leaky_relu(dot(h, w2) + b2, 0.2)
    return jax.nn.sigmoid(dot(h, w3) + b3)


if __name__ == "__main__":
    key = jax.random.PRNGKey(0)
    kx, kp = jax.random.split(key)

    image_size = 256   # flattened image feature size (e.g. 16x16)
    batch = 8

    x = jax.random.normal(kx, (batch, image_size), jnp.float32)
    params = init_params(kp, image_size)
    padded = pad_params(params, image_size)

    out = discriminator_forward(x, padded)
    out = jax.block_until_ready(out)
    assert out.shape == (batch, 1)

    # Kernel-math check: same bf16-in / f32-accum matmuls as the kernel.
    ref_bf16 = reference_forward_bf16(x, params)
    assert jnp.allclose(out, ref_bf16, atol=1e-4, rtol=1e-4), \
        float(jnp.max(jnp.abs(out - ref_bf16)))

    # Semantic check against the full-f32 PyTorch-equivalent forward.
    ref_f32 = reference_forward(x, params)
    assert jnp.allclose(out, ref_f32, atol=2e-2, rtol=2e-2), \
        float(jnp.max(jnp.abs(out - ref_f32)))

    print("KERNEL_OK")
</pallas_src>

<mosaic_0001>
module attributes {stable_mosaic.version = 11 : i64} {
  func.func @discriminator_kernel(%arg0: i32, %arg1: memref<8x256xbf16, #tpu.memory_space<vmem>>, %arg2: memref<256x512xbf16, #tpu.memory_space<vmem>>, %arg3: memref<1x512xf32, #tpu.memory_space<vmem>>, %arg4: memref<512x256xbf16, #tpu.memory_space<vmem>>, %arg5: memref<1x256xf32, #tpu.memory_space<vmem>>, %arg6: memref<256x128xbf16, #tpu.memory_space<vmem>>, %arg7: memref<1x128xf32, #tpu.memory_space<vmem>>, %arg8: memref<8x128xf32, #tpu.memory_space<vmem>>) attributes {dimension_semantics = [#tpu.dimension_semantics<parallel>], iteration_bounds = array<i64: 1>, scalar_prefetch = 0 : i64, scratch_operands = 0 : i64, tpu.core_type = #tpu.core_type<tc>, window_params = [{transform_indices = @transform_0, window_bounds = array<i64: 8, 256>}, {pipeline_mode = #tpu.pipeline_mode<synchronous>, transform_indices = @transform_1, window_bounds = array<i64: 256, 512>}, {pipeline_mode = #tpu.pipeline_mode<synchronous>, transform_indices = @transform_2, window_bounds = array<i64: 1, 512>}, {pipeline_mode = #tpu.pipeline_mode<synchronous>, transform_indices = @transform_3, window_bounds = array<i64: 512, 256>}, {pipeline_mode = #tpu.pipeline_mode<synchronous>, transform_indices = @transform_4, window_bounds = array<i64: 1, 256>}, {pipeline_mode = #tpu.pipeline_mode<synchronous>, transform_indices = @transform_5, window_bounds = array<i64: 256, 128>}, {pipeline_mode = #tpu.pipeline_mode<synchronous>, transform_indices = @transform_6, window_bounds = array<i64: 1, 128>}, {transform_indices = @transform_7, window_bounds = array<i64: 8, 128>}]} {
    %c0 = arith.constant 0 : index
    %c0_0 = arith.constant 0 : index
    %0 = vector.load %arg1[%c0, %c0_0] : memref<8x256xbf16, #tpu.memory_space<vmem>>, vector<8x256xbf16>
    %c0_1 = arith.constant 0 : index
    %c0_2 = arith.constant 0 : index
    %1 = vector.load %arg2[%c0_1, %c0_2] : memref<256x512xbf16, #tpu.memory_space<vmem>>, vector<256x512xbf16>
    %cst = arith.constant dense<0.000000e+00> : vector<8x512xf32>
    %2 = tpu.matmul %0, %1, %cst {dimension_numbers = #tpu.dot_dimension_numbers<[1], [0], [0], [1], [0, 0, 1, 1], [], []>} : vector<8x256xbf16>, vector<256x512xbf16>, vector<8x512xf32> -> vector<8x512xf32>
    %c0_3 = arith.constant 0 : index
    %c0_4 = arith.constant 0 : index
    %3 = vector.load %arg3[%c0_3, %c0_4] : memref<1x512xf32, #tpu.memory_space<vmem>>, vector<1x512xf32>
    %4 = vector.broadcast %3 : vector<1x512xf32> to vector<8x512xf32>
    %5 = arith.addf %2, %4 : vector<8x512xf32>
    %cst_5 = arith.constant 0.000000e+00 : f32
    %6 = vector.broadcast %cst_5 : f32 to vector<8x512xf32>
    %7 = arith.cmpf ogt, %5, %6 : vector<8x512xf32>
    %cst_6 = arith.constant 2.000000e-01 : f32
    %8 = vector.broadcast %cst_6 : f32 to vector<8x512xf32>
    %9 = arith.mulf %8, %5 : vector<8x512xf32>
    %10 = arith.select %7, %5, %9 : vector<8x512xi1>, vector<8x512xf32>
    %11 = arith.truncf %10 : vector<8x512xf32> to vector<8x512xbf16>
    %c0_7 = arith.constant 0 : index
    %c0_8 = arith.constant 0 : index
    %12 = vector.load %arg4[%c0_7, %c0_8] : memref<512x256xbf16, #tpu.memory_space<vmem>>, vector<512x256xbf16>
    %cst_9 = arith.constant dense<0.000000e+00> : vector<8x256xf32>
    %13 = tpu.matmul %11, %12, %cst_9 {dimension_numbers = #tpu.dot_dimension_numbers<[1], [0], [0], [1], [0, 0, 1, 1], [], []>} : vector<8x512xbf16>, vector<512x256xbf16>, vector<8x256xf32> -> vector<8x256xf32>
    %c0_10 = arith.constant 0 : index
    %c0_11 = arith.constant 0 : index
    %14 = vector.load %arg5[%c0_10, %c0_11] : memref<1x256xf32, #tpu.memory_space<vmem>>, vector<1x256xf32>
    %15 = vector.broadcast %14 : vector<1x256xf32> to vector<8x256xf32>
    %16 = arith.addf %13, %15 : vector<8x256xf32>
    %cst_12 = arith.constant 0.000000e+00 : f32
    %17 = vector.broadcast %cst_12 : f32 to vector<8x256xf32>
    %18 = arith.cmpf ogt, %16, %17 : vector<8x256xf32>
    %cst_13 = arith.constant 2.000000e-01 : f32
    %19 = vector.broadcast %cst_13 : f32 to vector<8x256xf32>
    %20 = arith.mulf %19, %16 : vector<8x256xf32>
    %21 = arith.select %18, %16, %20 : vector<8x256xi1>, vector<8x256xf32>
    %22 = arith.truncf %21 : vector<8x256xf32> to vector<8x256xbf16>
    %c0_14 = arith.constant 0 : index
    %c0_15 = arith.constant 0 : index
    %23 = vector.load %arg6[%c0_14, %c0_15] : memref<256x128xbf16, #tpu.memory_space<vmem>>, vector<256x128xbf16>
    %cst_16 = arith.constant dense<0.000000e+00> : vector<8x128xf32>
    %24 = tpu.matmul %22, %23, %cst_16 {dimension_numbers = #tpu.dot_dimension_numbers<[1], [0], [0], [1], [0, 0, 1, 1], [], []>} : vector<8x256xbf16>, vector<256x128xbf16>, vector<8x128xf32> -> vector<8x128xf32>
    %c0_17 = arith.constant 0 : index
    %c0_18 = arith.constant 0 : index
    %25 = vector.load %arg7[%c0_17, %c0_18] : memref<1x128xf32, #tpu.memory_space<vmem>>, vector<1x128xf32>
    %26 = vector.broadcast %25 : vector<1x128xf32> to vector<8x128xf32>
    %27 = arith.addf %24, %26 : vector<8x128xf32>
    %28 = arith.negf %27 : vector<8x128xf32>
    %29 = math.exp %28 : vector<8x128xf32>
    %cst_19 = arith.constant 1.000000e+00 : f32
    %30 = vector.broadcast %cst_19 : f32 to vector<8x128xf32>
    %31 = arith.addf %30, %29 : vector<8x128xf32>
    %32 = arith.divf %30, %31 : vector<8x128xf32>
    %c0_20 = arith.constant 0 : index
    %c0_21 = arith.constant 0 : index
    %33 = vector.load %arg8[%c0_20, %c0_21] : memref<8x128xf32, #tpu.memory_space<vmem>>, vector<8x128xf32>
    tpu.vector_store %arg8[%c0_20, %c0_21], %32 {strides = array<i32>} : memref<8x128xf32, #tpu.memory_space<vmem>>, vector<8x128xf32>,
    return
  }
  func.func @transform_0(%arg0: i32) -> (i32, i32) {
    %c0_i32 = arith.constant 0 : i32
    %c0_i32_0 = arith.constant 0 : i32
    return %arg0, %c0_i32 : i32, i32
  }
  func.func @transform_1(%arg0: i32) -> (i32, i32) {
    %c0_i32 = arith.constant 0 : i32
    %c0_i32_0 = arith.constant 0 : i32
    %c0_i32_1 = arith.constant 0 : i32
    return %c0_i32, %c0_i32_0 : i32, i32
  }
  func.func @transform_2(%arg0: i32) -> (i32, i32) {
    %c0_i32 = arith.constant 0 : i32
    %c0_i32_0 = arith.constant 0 : i32
    %c0_i32_1 = arith.constant 0 : i32
    return %c0_i32, %c0_i32_0 : i32, i32
  }
  func.func @transform_3(%arg0: i32) -> (i32, i32) {
    %c0_i32 = arith.constant 0 : i32
    %c0_i32_0 = arith.constant 0 : i32
    %c0_i32_1 = arith.constant 0 : i32
    return %c0_i32, %c0_i32_0 : i32, i32
  }
  func.func @transform_4(%arg0: i32) -> (i32, i32) {
    %c0_i32 = arith.constant 0 : i32
    %c0_i32_0 = arith.constant 0 : i32
    %c0_i32_1 = arith.constant 0 : i32
    return %c0_i32, %c0_i32_0 : i32, i32
  }
  func.func @transform_5(%arg0: i32) -> (i32, i32) {
    %c0_i32 = arith.constant 0 : i32
    %c0_i32_0 = arith.constant 0 : i32
    %c0_i32_1 = arith.constant 0 : i32
    return %c0_i32, %c0_i32_0 : i32, i32
  }
  func.func @transform_6(%arg0: i32) -> (i32, i32) {
    %c0_i32 = arith.constant 0 : i32
    %c0_i32_0 = arith.constant 0 : i32
    %c0_i32_1 = arith.constant 0 : i32
    return %c0_i32, %c0_i32_0 : i32, i32
  }
  func.func @transform_7(%arg0: i32) -> (i32, i32) {
    %c0_i32 = arith.constant 0 : i32
    %c0_i32_0 = arith.constant 0 : i32
    return %arg0, %c0_i32 : i32, i32
  }
}

</mosaic_0001>

<bundles_post_ra>
// kernel: tpu_custom_call.1
= control target key start
LH: loop header
LB: loop body
LE: loop exit
PB: predicated region body
PF: predicated region fallthrough
CT: control target
= control target key end

     0   :  { %12 = vsyncpa [#allocation3], 0  ;;  %s2087_s0 = inlined_call_operand.hbm [shape: bf16[8,256], index: 0, kind: input, shape index: {}]   ;;  %s2088_s1 = inlined_call_operand.hbm [shape: bf16[256,512], index: 1, kind: input, shape index: {}]   ;;  %s2089_s2 = inlined_call_operand.hbm [shape: f32[1,512], index: 2, kind: input, shape index: {}]   ;;  %s2090_s3 = inlined_call_operand.hbm [shape: bf16[512,256], index: 3, kind: input, shape index: {}]   ;;  %s2091_s4 = inlined_call_operand.hbm [shape: f32[1,256], index: 4, kind: input, shape index: {}]   ;;  %s2092_s5 = inlined_call_operand.hbm [shape: bf16[256,128], index: 5, kind: input, shape index: {}]   ;;  %s2093_s6 = inlined_call_operand.hbm [shape: f32[1,128], index: 6, kind: input, shape index: {}]   ;;  %s2094_s7 = inlined_call_operand.hbm [shape: f32[8,128], index: 7, kind: output, shape index: {}]  }
   0x1   :  { %13 = vsyncpa [#allocation6], 0 }
   0x2   :  { %14 = vsyncpa [#allocation9], 0 }
   0x3   :  { %15 = vsyncpa [#allocation12], 0 }
   0x4   :  { %16 = vsyncpa [#allocation4], 0  ;;  %s1903_s24 = smov [#allocation5]   ;;  %s1717_s28 = scalar_lea.hbm %s2088_s1, 8192 }
   0x5   :  { %s32_s25 = sshll.u32 %s1903_s24, 4  ;;  %p1718_p0 = scmp.ne.s32.totalorder %s2088_s1, %s1717_s28  ;;  %s33_s25 = int_to_ptr.vmem [resolvable:$true] %s32_s25 }
   0x6   :  { %p1721_p1 = scmp.lt.u32.totalorder %s1717_s28, %s2088_s1 }
   0x8   :  { %p1723_p2 = pnand %p1721_p1, %p1718_p0 }
   0xa   :  { %1726 = shalt.err (!%p1723_p2)
}
   0xb   :  { %s1727_s10 = scalar_lea.vmem %s33_s25, 8192  ;;  %p1732_p4 = scmp.lt.s32.totalorder %s33_s25, %s33_s25 }
   0xc   :  { %p1728_p3 = scmp.ne.s32.totalorder %s33_s25, %s1727_s10  ;;  %p1733_p5 = scmp.lt.s32.totalorder %s1727_s10, %s1727_s10 }
   0xe   :  { %p1734_p6 = por %p1733_p5, %p1732_p4 }
  0x10   :  { %p1735_p7 = pnand %p1734_p6, %p1728_p3 }
  0x12   :  { %1738 = shalt.err (!%p1735_p7)
}
  0x13   :  { %s1904_s11 = smov 256   ;;  %s1905_s12 = smov 16  }
  0x14   :  { %38 = dma.hbm_to_vmem [thread:$0]  %s2088_s1, 8192, %s33_s25, [#allocation6], %s1904_s11, %s1904_s11, %s1905_s12  }
  0x15   :  { %s1906_s15 = smov [#allocation8]   ;;  %s1739_s19 = scalar_lea.hbm %s2090_s3, 8192 }
  0x16   :  { %s54_s16 = sshll.u32 %s1906_s15, 4  ;;  %p1740_p8 = scmp.ne.s32.totalorder %s2090_s3, %s1739_s19  ;;  %s55_s16 = int_to_ptr.vmem [resolvable:$true] %s54_s16 }
  0x17   :  { %p1743_p9 = scmp.lt.u32.totalorder %s1739_s19, %s2090_s3 }
  0x19   :  { %p1745_p10 = pnand %p1743_p9, %p1740_p8 }
  0x1b   :  { %1748 = shalt.err (!%p1745_p10)
}
  0x1c   :  { %s1749_s24 = scalar_lea.vmem %s55_s16, 8192  ;;  %p1754_p12 = scmp.lt.s32.totalorder %s55_s16, %s55_s16 }
  0x1d   :  { %p1750_p11 = scmp.ne.s32.totalorder %s55_s16, %s1749_s24  ;;  %p1755_p13 = scmp.lt.s32.totalorder %s1749_s24, %s1749_s24 }
  0x1f   :  { %p1756_p0 = por %p1755_p13, %p1754_p12 }
  0x21   :  { %p1757_p1 = pnand %p1756_p0, %p1750_p11 }
  0x23   :  { %1760 = shalt.err (!%p1757_p1)
}
  0x24   :  { %s1907_s1 = smov 128   ;;  %s1908_s25 = smov 8  }
  0x25   :  { %60 = dma.hbm_to_vmem [thread:$0]  %s2090_s3, 8192, %s55_s16, [#allocation9], %s1907_s1, %s1907_s1, %s1908_s25  }
  0x26   :  { %s1909_s28 = smov [#allocation11]   ;;  %s1761_s9 = scalar_lea.hbm %s2092_s5, 2048 }
  0x27   :  { %s76_s29 = sshll.u32 %s1909_s28, 4  ;;  %p1762_p2 = scmp.ne.s32.totalorder %s2092_s5, %s1761_s9  ;;  %s77_s29 = int_to_ptr.vmem [resolvable:$true] %s76_s29 }
  0x28   :  { %p1765_p3 = scmp.lt.u32.totalorder %s1761_s9, %s2092_s5 }
  0x2a   :  { %p1767_p4 = pnand %p1765_p3, %p1762_p2 }
  0x2c   :  { %1770 = shalt.err (!%p1767_p4)
}
  0x2d   :  { %s1771_s14 = scalar_lea.vmem %s77_s29, 2048  ;;  %p1776_p6 = scmp.lt.s32.totalorder %s77_s29, %s77_s29 }
  0x2e   :  { %p1772_p5 = scmp.ne.s32.totalorder %s77_s29, %s1771_s14  ;;  %p1777_p7 = scmp.lt.s32.totalorder %s1771_s14, %s1771_s14 }
  0x30   :  { %p1778_p8 = por %p1777_p7, %p1776_p6 }
  0x32   :  { %p1779_p9 = pnand %p1778_p8, %p1772_p5 }
  0x34   :  { %1782 = shalt.err (!%p1779_p9)
}
  0x35   :  { %s1910_s3 = smov 64   ;;  %s1911_s15 = smov 4  }
  0x36   :  { %82 = dma.hbm_to_vmem [thread:$0]  %s2092_s5, 2048, %s77_s29, [#allocation12], %s1910_s3, %s1910_s3, %s1911_s15  }
  0x37   :  { %s1912_s18 = smov [#allocation2]   ;;  %s1913_s20 = smov [#allocation7]  }
  0x38   :  { %s23_s19 = sshll.u32 %s1912_s18, 4  ;;  %s45_s21 = sshll.u32 %s1913_s20, 4  ;;  %s24_s19 = int_to_ptr.vmem [resolvable:$true] %s23_s19  ;;  %s46_s21 = int_to_ptr.vmem [resolvable:$true] %s45_s21 }
  0x39   :  { %s1783_s24 = scalar_lea.hbm %s2087_s0, 128 }
  0x3a   :  { %p1784_p10 = scmp.ne.s32.totalorder %s2087_s0, %s1783_s24  ;;  %p1787_p11 = scmp.lt.u32.totalorder %s1783_s24, %s2087_s0 }
  0x3c   :  { %p1789_p12 = pnand %p1787_p11, %p1784_p10 }
  0x3e   :  { %1792 = shalt.err (!%p1789_p12)
}
  0x3f   :  { %s1793_s5 = scalar_lea.vmem %s24_s19, 128  ;;  %p1798_p0 = scmp.lt.s32.totalorder %s24_s19, %s24_s19 }
  0x40   :  { %p1794_p13 = scmp.ne.s32.totalorder %s24_s19, %s1793_s5  ;;  %p1799_p1 = scmp.lt.s32.totalorder %s1793_s5, %s1793_s5 }
  0x42   :  { %p1800_p2 = por %p1799_p1, %p1798_p0 }
  0x44   :  { %p1801_p3 = pnand %p1800_p2, %p1794_p13 }
  0x46   :  { %1804 = shalt.err (!%p1801_p3)
}
  0x47   :  { %26 = dma.hbm_to_vmem [thread:$0]  %s2087_s0, 128, %s24_s19, [#allocation3]  }
  0x48   :  { %s1805_s9 = scalar_lea.hbm %s2089_s2, 64 }
  0x49   :  { %p1806_p4 = scmp.ne.s32.totalorder %s2089_s2, %s1805_s9  ;;  %p1809_p5 = scmp.lt.u32.totalorder %s1805_s9, %s2089_s2 }
  0x4b   :  { %p1811_p6 = pnand %p1809_p5, %p1806_p4 }
  0x4d   :  { %1814 = shalt.err (!%p1811_p6)
}
  0x4e   :  { %s1815_s14 = scalar_lea.vmem %s46_s21, 64  ;;  %p1820_p8 = scmp.lt.s32.totalorder %s46_s21, %s46_s21 }
  0x4f   :  { %p1816_p7 = scmp.ne.s32.totalorder %s46_s21, %s1815_s14  ;;  %p1821_p9 = scmp.lt.s32.totalorder %s1815_s14, %s1815_s14 }
  0x51   :  { %p1822_p10 = por %p1821_p9, %p1820_p8 }
  0x53   :  { %p1823_p11 = pnand %p1822_p10, %p1816_p7 }
  0x55   :  { %1826 = shalt.err (!%p1823_p11)
}
  0x56   :  { %48 = dma.hbm_to_vmem [thread:$0]  %s2089_s2, 64, %s46_s21, [#allocation6]  }
  0x57   :  { %s1914_s15 = smov [#allocation10]   ;;  %s1915_s17 = smov [#allocation13]  }
  0x58   :  { %s67_s16 = sshll.u32 %s1914_s15, 4  ;;  %s89_s18 = sshll.u32 %s1915_s17, 4  ;;  %s68_s16 = int_to_ptr.vmem [resolvable:$true] %s67_s16  ;;  %s90_s18 = int_to_ptr.vmem [resolvable:$true] %s89_s18 }
  0x59   :  { %s1827_s22 = scalar_lea.hbm %s2091_s4, 32 }
  0x5a   :  { %p1828_p12 = scmp.ne.s32.totalorder %s2091_s4, %s1827_s22  ;;  %p1831_p13 = scmp.lt.u32.totalorder %s1827_s22, %s2091_s4 }
  0x5c   :  { %p1833_p0 = pnand %p1831_p13, %p1828_p12 }
  0x5e   :  { %1836 = shalt.err (!%p1833_p0)
}
  0x5f   :  { %s1837_s2 = scalar_lea.vmem %s68_s16, 32  ;;  %p1842_p2 = scmp.lt.s32.totalorder %s68_s16, %s68_s16 }
  0x60   :  { %p1838_p1 = scmp.ne.s32.totalorder %s68_s16, %s1837_s2  ;;  %p1843_p3 = scmp.lt.s32.totalorder %s1837_s2, %s1837_s2 }
  0x62   :  { %p1844_p4 = por %p1843_p3, %p1842_p2 }
  0x64   :  { %p1845_p5 = pnand %p1844_p4, %p1838_p1 }
  0x66   :  { %1848 = shalt.err (!%p1845_p5)
}
  0x67   :  { %70 = dma.hbm_to_vmem [thread:$0]  %s2091_s4, 32, %s68_s16, [#allocation9]  }
  0x68   :  { %s1849_s28 = scalar_lea.hbm %s2093_s6, 16 }
  0x69   :  { %p1850_p6 = scmp.ne.s32.totalorder %s2093_s6, %s1849_s28  ;;  %p1853_p7 = scmp.lt.u32.totalorder %s1849_s28, %s2093_s6 }
  0x6b   :  { %p1855_p8 = pnand %p1853_p7, %p1850_p6 }
  0x6d   :  { %1858 = shalt.err (!%p1855_p8)
}
  0x6e   :  { %s1859_s10 = scalar_lea.vmem %s90_s18, 16  ;;  %s1863_s11 = scalar_lea.vmem %s90_s18, 32 }
  0x6f   :  { %p1860_p9 = scmp.ne.s32.totalorder %s90_s18, %s1859_s10  ;;  %p1864_p10 = scmp.lt.s32.totalorder %s90_s18, %s90_s18 }
  0x70   :  { %p1865_p11 = scmp.lt.s32.totalorder %s1863_s11, %s1859_s10 }
  0x72   :  { %p1866_p12 = por %p1865_p11, %p1864_p10 }
  0x74   :  { %p1867_p13 = pnand %p1866_p12, %p1860_p9 }
  0x76   :  { %1870 = shalt.err (!%p1867_p13)
}
  0x77   :  { %92 = dma.hbm_to_vmem [thread:$0]  %s2093_s6, 16, %s90_s18, [#allocation12]  }
  0x78   :  { %1893 = dma.done.wait [#allocation3], 128  }
  0x79   :  { %1894 = vsyncadd [#allocation3], 4294967168 }
  0x7a   :  { %1895 = dma.done.wait [#allocation6], 8256  }
  0x7b   :  { %1896 = vsyncadd [#allocation6], 4294959040 }
  0x7c   :  { %1897 = dma.done.wait [#allocation9], 8224  }
  0x7d   :  { %1898 = vsyncadd [#allocation9], 4294959072 }
  0x7e   :  { %1899 = dma.done.wait [#allocation12], 2064  }
  0x7f   :  { %1900 = vsyncadd [#allocation12], 4294965232  ;;  %v1503_v0 = vld [vmem:[#allocation5 + $0x4] ss:$16 sps:$4 sm:$0xff]   ;;  %v1505_v1 = vld [vmem:[#allocation5] ss:$16 sps:$4 sm:$0xff]  }
  0x80   :  { %529 = vmatprep.subr.bf16.mxu1 %v1503_v0  ;;  %v1506_v2 = vld [vmem:[#allocation5 + $0x24] ss:$16 sps:$4 sm:$0xff]   ;;  %v1508_v3 = vld [vmem:[#allocation5 + $0x20] ss:$16 sps:$4 sm:$0xff]   ;;  %v2041_v13 = vld [vmem:[#allocation2] sm:$0xff]  ;;  %s1916_s6 = smov [#allocation14]  }
  0x81   :  { %530 = vmatpush1.bf16.msra.mxu1 %v1505_v1  ;;  %v1509_v4 = vld [vmem:[#allocation5 + $0x44] ss:$16 sps:$4 sm:$0xff]   ;;  %v1511_v5 = vld [vmem:[#allocation5 + $0x40] ss:$16 sps:$4 sm:$0xff]   ;;  %v2045_v14 = vcombine.high %v2041_v13, %v2041_v13  ;;  %v1555_v45 = vld [vmem:[#allocation5 + $0xc] ss:$16 sps:$4 sm:$0xff]   ;;  %v2050_v48 = vcombine.low %v2041_v13, %v2041_v13 }
  0x82   :  { %531 = vmatprep.subr.bf16.mxu1 %v1506_v2  ;;  %v1512_v6 = vld [vmem:[#allocation5 + $0x64] ss:$16 sps:$4 sm:$0xff]   ;;  %v1514_v7 = vld [vmem:[#allocation5 + $0x60] ss:$16 sps:$4 sm:$0xff]   ;;  %v1553_v46 = vld [vmem:[#allocation5 + $0x8] ss:$16 sps:$4 sm:$0xff]  }
  0x83   :  { %v1515_v8 = vld [vmem:[#allocation5 + $0x84] ss:$16 sps:$4 sm:$0xff]   ;;  %v1517_v9 = vld [vmem:[#allocation5 + $0x80] ss:$16 sps:$4 sm:$0xff]   ;;  %561 = vmatprep.mubr.bf16.mxu1 %v2045_v14  ;;  %v1558_v49 = vld [vmem:[#allocation5 + $0x2c] ss:$16 sps:$4 sm:$0xff]  }
  0x84   :  { %v1518_v10 = vld [vmem:[#allocation5 + $0xa4] ss:$16 sps:$4 sm:$0xff]   ;;  %v1520_v11 = vld [vmem:[#allocation5 + $0xa0] ss:$16 sps:$4 sm:$0xff]   ;;  %v1556_v52 = vld [vmem:[#allocation5 + $0x28] ss:$16 sps:$4 sm:$0xff]  }
  0x85   :  { %532 = vmatpush1.bf16.msra.mxu1 %v1508_v3  ;;  %v1521_v12 = vld [vmem:[#allocation5 + $0xc4] ss:$16 sps:$4 sm:$0xff]   ;;  %v1523_v15 = vld [vmem:[#allocation5 + $0xc0] ss:$16 sps:$4 sm:$0xff]   ;;  %v1561_v54 = vld [vmem:[#allocation5 + $0x4c] ss:$16 sps:$4 sm:$0xff]  }
  0x86   :  { %533 = vmatprep.subr.bf16.mxu1 %v1509_v4  ;;  %v1524_v16 = vld [vmem:[#allocation5 + $0xe4] ss:$16 sps:$4 sm:$0xff]   ;;  %v1526_v17 = vld [vmem:[#allocation5 + $0xe0] ss:$16 sps:$4 sm:$0xff]   ;;  %v1559_v56 = vld [vmem:[#allocation5 + $0x48] ss:$16 sps:$4 sm:$0xff]  }
  0x87   :  { %v1527_v18 = vld [vmem:[#allocation5 + $0x104] ss:$16 sps:$4 sm:$0xff]   ;;  %v1529_v19 = vld [vmem:[#allocation5 + $0x100] ss:$16 sps:$4 sm:$0xff]   ;;  %v1564_v58 = vld [vmem:[#allocation5 + $0x6c] ss:$16 sps:$4 sm:$0xff]  }
  0x88   :  { %v1530_v20 = vld [vmem:[#allocation5 + $0x124] ss:$16 sps:$4 sm:$0xff]   ;;  %v1532_v21 = vld [vmem:[#allocation5 + $0x120] ss:$16 sps:$4 sm:$0xff]   ;;  %v1562_v60 = vld [vmem:[#allocation5 + $0x68] ss:$16 sps:$4 sm:$0xff]  }
  0x89   :  { %534 = vmatpush1.bf16.msra.mxu1 %v1511_v5  ;;  %v1533_v22 = vld [vmem:[#allocation5 + $0x144] ss:$16 sps:$4 sm:$0xff]   ;;  %v1535_v23 = vld [vmem:[#allocation5 + $0x140] ss:$16 sps:$4 sm:$0xff]   ;;  %v1567_v62 = vld [vmem:[#allocation5 + $0x8c] ss:$16 sps:$4 sm:$0xff]  }
  0x8a   :  { %535 = vmatprep.subr.bf16.mxu1 %v1512_v6  ;;  %v1536_v24 = vld [vmem:[#allocation5 + $0x164] ss:$16 sps:$4 sm:$0xff]   ;;  %v1538_v25 = vld [vmem:[#allocation5 + $0x160] ss:$16 sps:$4 sm:$0xff]   ;;  %v1565_v0 = vld [vmem:[#allocation5 + $0x88] ss:$16 sps:$4 sm:$0xff]  }
  0x8b   :  { %v1539_v26 = vld [vmem:[#allocation5 + $0x184] ss:$16 sps:$4 sm:$0xff]   ;;  %v1601_v27 = vld [vmem:[#allocation8 + $0x4] ss:$8 sps:$4 sm:$0xff]   ;;  %v1604_v29 = vld [vmem:[#allocation8 + $0x14] ss:$8 sps:$4 sm:$0xff]  }
  0x8c   :  { %v1603_v28 = vld [vmem:[#allocation8] ss:$8 sps:$4 sm:$0xff]   ;;  %1023 = vmatprep.subr.bf16.mxu0 %v1601_v27  ;;  %v1541_v30 = vld [vmem:[#allocation5 + $0x180] ss:$16 sps:$4 sm:$0xff]   ;;  %v1606_v31 = vld [vmem:[#allocation8 + $0x10] ss:$8 sps:$4 sm:$0xff]  }
  0x8d   :  { %536 = vmatpush1.bf16.msra.mxu1 %v1514_v7  ;;  %1024 = vmatpush1.bf16.msra.mxu0 %v1603_v28  ;;  %v1607_v32 = vld [vmem:[#allocation8 + $0x24] ss:$8 sps:$4 sm:$0xff]   ;;  %v1542_v33 = vld [vmem:[#allocation5 + $0x1a4] ss:$16 sps:$4 sm:$0xff]   ;;  %v1610_v36 = vld [vmem:[#allocation8 + $0x34] ss:$8 sps:$4 sm:$0xff]  }
  0x8e   :  { %537 = vmatprep.subr.bf16.mxu1 %v1515_v8  ;;  %1025 = vmatprep.subr.bf16.mxu0 %v1604_v29  ;;  %v1544_v34 = vld [vmem:[#allocation5 + $0x1a0] ss:$16 sps:$4 sm:$0xff]   ;;  %v1609_v35 = vld [vmem:[#allocation8 + $0x20] ss:$8 sps:$4 sm:$0xff]   ;;  %v1612_v39 = vld [vmem:[#allocation8 + $0x30] ss:$8 sps:$4 sm:$0xff]  }
  0x8f   :  { %v1545_v37 = vld [vmem:[#allocation5 + $0x1c4] ss:$16 sps:$4 sm:$0xff]   ;;  %v1547_v38 = vld [vmem:[#allocation5 + $0x1c0] ss:$16 sps:$4 sm:$0xff]   ;;  %v1570_v2 = vld [vmem:[#allocation5 + $0xac] ss:$16 sps:$4 sm:$0xff]  }
  0x90   :  { %v1613_v40 = vld [vmem:[#allocation8 + $0x44] ss:$8 sps:$4 sm:$0xff]   ;;  %v1548_v41 = vld [vmem:[#allocation5 + $0x1e4] ss:$16 sps:$4 sm:$0xff]   ;;  %v1616_v44 = vld [vmem:[#allocation8 + $0x54] ss:$8 sps:$4 sm:$0xff]  }
  0x91   :  { %538 = vmatpush1.bf16.msra.mxu1 %v1517_v9  ;;  %1026 = vmatpush1.bf16.msra.mxu0 %v1606_v31  ;;  %v1550_v42 = vld [vmem:[#allocation5 + $0x1e0] ss:$16 sps:$4 sm:$0xff]   ;;  %v1615_v43 = vld [vmem:[#allocation8 + $0x40] ss:$8 sps:$4 sm:$0xff]   ;;  %v1618_v47 = vld [vmem:[#allocation8 + $0x50] ss:$8 sps:$4 sm:$0xff]  }
  0x92   :  { %539 = vmatprep.subr.bf16.mxu1 %v1518_v10  ;;  %1027 = vmatprep.subr.bf16.mxu0 %v1607_v32  ;;  %v1619_v50 = vld [vmem:[#allocation8 + $0x64] ss:$8 sps:$4 sm:$0xff]   ;;  %v1621_v51 = vld [vmem:[#allocation8 + $0x60] ss:$8 sps:$4 sm:$0xff]   ;;  %v1622_v53 = vld [vmem:[#allocation8 + $0x74] ss:$8 sps:$4 sm:$0xff]  }
  0x93   :  { %v1624_v55 = vld [vmem:[#allocation8 + $0x70] ss:$8 sps:$4 sm:$0xff]   ;;  %v1625_v57 = vld [vmem:[#allocation8 + $0x84] ss:$8 sps:$4 sm:$0xff]   ;;  %v1627_v59 = vld [vmem:[#allocation8 + $0x80] ss:$8 sps:$4 sm:$0xff]  }
  0x94   :  { %v1628_v61 = vld [vmem:[#allocation8 + $0x94] ss:$8 sps:$4 sm:$0xff]   ;;  %v1630_v63 = vld [vmem:[#allocation8 + $0x90] ss:$8 sps:$4 sm:$0xff]   ;;  %v1631_v1 = vld [vmem:[#allocation8 + $0xa4] ss:$8 sps:$4 sm:$0xff]  }
  0x95   :  { %540 = vmatpush1.bf16.msra.mxu1 %v1520_v11  ;;  %1028 = vmatpush1.bf16.msra.mxu0 %v1609_v35  ;;  %v1633_v3 = vld [vmem:[#allocation8 + $0xa0] ss:$8 sps:$4 sm:$0xff]   ;;  %v1568_v4 = vld [vmem:[#allocation5 + $0xa8] ss:$16 sps:$4 sm:$0xff]   ;;  %v1636_v7 = vld [vmem:[#allocation8 + $0xb0] ss:$8 sps:$4 sm:$0xff]  }
  0x96   :  { %541 = vmatprep.subr.bf16.mxu1 %v1521_v12  ;;  %1029 = vmatprep.subr.bf16.mxu0 %v1610_v36  ;;  %v1634_v5 = vld [vmem:[#allocation8 + $0xb4] ss:$8 sps:$4 sm:$0xff]   ;;  %v1573_v6 = vld [vmem:[#allocation5 + $0xcc] ss:$16 sps:$4 sm:$0xff]   ;;  %v1637_v9 = vld [vmem:[#allocation8 + $0xc4] ss:$8 sps:$4 sm:$0xff]  }
  0x97   :  { %v1571_v8 = vld [vmem:[#allocation5 + $0xc8] ss:$16 sps:$4 sm:$0xff]   ;;  %v1576_v10 = vld [vmem:[#allocation5 + $0xec] ss:$16 sps:$4 sm:$0xff]   ;;  %s1301_s13 = sshll.u32 %s1916_s6, 4  ;;  %s1302_s13 = int_to_ptr.vmem [resolvable:$true] %s1301_s13 }
  0x98   :  { %v1639_v11 = vld [vmem:[#allocation8 + $0xc0] ss:$8 sps:$4 sm:$0xff]   ;;  %v1574_v12 = vld [vmem:[#allocation5 + $0xe8] ss:$16 sps:$4 sm:$0xff]   ;;  %s1871_s14 = scalar_lea.vmem %s1302_s13, 128  ;;  %p1876_p1 = scmp.lt.s32.totalorder %s1302_s13, %s1302_s13 }
  0x99   :  { %542 = vmatpush1.bf16.msra.mxu1 %v1523_v15  ;;  %1030 = vmatpush1.bf16.msra.mxu0 %v1612_v39  ;;  %v1640_v13 = vld [vmem:[#allocation8 + $0xd4] ss:$8 sps:$4 sm:$0xff]   ;;  %v1642_v15 = vld [vmem:[#allocation8 + $0xd0] ss:$8 sps:$4 sm:$0xff]   ;;  %v1643_v31 = vld [vmem:[#allocation8 + $0xe4] ss:$8 sps:$4 sm:$0xff]   ;;  %p1872_p0 = scmp.ne.s32.totalorder %s1302_s13, %s1871_s14  ;;  %p1877_p2 = scmp.lt.s32.totalorder %s1871_s14, %s1871_s14 }
  0x9a   :  { %543 = vmatprep.subr.bf16.mxu1 %v1524_v16  ;;  %1031 = vmatprep.subr.bf16.mxu0 %v1613_v40  ;;  %v1577_v16 = vld [vmem:[#allocation5 + $0x108] ss:$16 sps:$4 sm:$0xff]   ;;  %v1597_v27 = vld [vmem:[#allocation5 + $0x1cc] ss:$16 sps:$4 sm:$0xff]  }
  0x9b   :  { %v1595_v28 = vld [vmem:[#allocation5 + $0x1c8] ss:$16 sps:$4 sm:$0xff]   ;;  %v1600_v29 = vld [vmem:[#allocation5 + $0x1ec] ss:$16 sps:$4 sm:$0xff]   ;;  %p1878_p3 = por %p1877_p2, %p1876_p1 }
  0x9c   :  { %v1645_v32 = vld [vmem:[#allocation8 + $0xe0] ss:$8 sps:$4 sm:$0xff]   ;;  %v1651_v35 = vld [vmem:[#allocation8 + $0x104] ss:$8 sps:$4 sm:$0xff]   ;;  %v1701_v40 = vld [vmem:[#allocation11 + $0x50] sm:$0xff]  }
  0x9d   :  { %544 = vmatpush1.bf16.msra.mxu1 %v1526_v17  ;;  %1032 = vmatpush1.bf16.msra.mxu0 %v1615_v43  ;;  %v1582_v17 = vld [vmem:[#allocation5 + $0x12c] ss:$16 sps:$4 sm:$0xff]   ;;  %p1879_p4 = pnand %p1878_p3, %p1872_p0 }
  0x9e   :  { %545 = vmatprep.subr.bf16.mxu1 %v1527_v18  ;;  %1033 = vmatprep.subr.bf16.mxu0 %v1616_v44  ;;  %v1580_v18 = vld [vmem:[#allocation5 + $0x128] ss:$16 sps:$4 sm:$0xff]   ;;  %v1700_v39 = vld [vmem:[#allocation11 + $0x8] sm:$0xff]   ;;  %v1704_v43 = vld [vmem:[#allocation11 + $0x18] sm:$0xff]  }
  0x9f   :  { %v1697_v36 = vld [vmem:[#allocation11 + $0x40] sm:$0xff]  }
  0xa0   :  { %v1705_v44 = vld [vmem:[#allocation11 + $0x60] sm:$0xff]  }
  0xa1   :  { %546 = vmatpush1.bf16.msra.mxu1 %v1529_v19  ;;  %1034 = vmatpush1.bf16.msra.mxu0 %v1618_v47  ;;  %v1585_v19 = vld [vmem:[#allocation5 + $0x14c] ss:$16 sps:$4 sm:$0xff]  }
  0xa2   :  { %547 = vmatprep.subr.bf16.mxu1 %v1530_v20  ;;  %1035 = vmatprep.subr.bf16.mxu0 %v1619_v50  ;;  %v1583_v20 = vld [vmem:[#allocation5 + $0x148] ss:$16 sps:$4 sm:$0xff]   ;;  %v1708_v47 = vld [vmem:[#allocation11 + $0x28] sm:$0xff]  }
  0xa5   :  { %548 = vmatpush1.bf16.msra.mxu1 %v1532_v21  ;;  %1036 = vmatpush1.bf16.msra.mxu0 %v1621_v51  ;;  %v1588_v21 = vld [vmem:[#allocation5 + $0x16c] ss:$16 sps:$4 sm:$0xff]   ;;  %v2058_v51 = vld [vmem:[#allocation7] sm:$0xf] }
  0xa6   :  { %549 = vmatprep.subr.bf16.mxu1 %v1533_v22  ;;  %1037 = vmatprep.subr.bf16.mxu0 %v1622_v53  ;;  %v1586_v22 = vld [vmem:[#allocation5 + $0x168] ss:$16 sps:$4 sm:$0xff]  }
  0xa9   :  { %550 = vmatpush1.bf16.msra.mxu1 %v1535_v23  ;;  %1038 = vmatpush1.bf16.msra.mxu0 %v1624_v55  ;;  %v1591_v23 = vld [vmem:[#allocation5 + $0x18c] ss:$16 sps:$4 sm:$0xff]  }
  0xaa   :  { %551 = vmatprep.subr.bf16.mxu1 %v1536_v24  ;;  %1039 = vmatprep.subr.bf16.mxu0 %v1625_v57  ;;  %v1589_v24 = vld [vmem:[#allocation5 + $0x188] ss:$16 sps:$4 sm:$0xff]  }
  0xad   :  { %552 = vmatpush1.bf16.msra.mxu1 %v1538_v25  ;;  %1040 = vmatpush1.bf16.msra.mxu0 %v1627_v59  ;;  %v1594_v25 = vld [vmem:[#allocation5 + $0x1ac] ss:$16 sps:$4 sm:$0xff]  }
  0xae   :  { %553 = vmatprep.subr.bf16.mxu1 %v1539_v26  ;;  %1041 = vmatprep.subr.bf16.mxu0 %v1628_v61  ;;  %v1592_v26 = vld [vmem:[#allocation5 + $0x1a8] ss:$16 sps:$4 sm:$0xff]  }
  0xb1   :  { %554 = vmatpush1.bf16.msra.mxu1 %v1541_v30  ;;  %1042 = vmatpush1.bf16.msra.mxu0 %v1630_v63  ;;  %v1598_v30 = vld [vmem:[#allocation5 + $0x1e8] ss:$16 sps:$4 sm:$0xff]  }
  0xb2   :  { %555 = vmatprep.subr.bf16.mxu1 %v1542_v33  ;;  %1043 = vmatprep.subr.bf16.mxu0 %v1631_v1  ;;  %v1646_v33 = vld [vmem:[#allocation8 + $0xf4] ss:$8 sps:$4 sm:$0xff]  }
  0xb5   :  { %556 = vmatpush1.bf16.msra.mxu1 %v1544_v34  ;;  %1044 = vmatpush1.bf16.msra.mxu0 %v1633_v3  ;;  %v1648_v34 = vld [vmem:[#allocation8 + $0xf0] ss:$8 sps:$4 sm:$0xff]  }
  0xb6   :  { %557 = vmatprep.subr.bf16.mxu1 %v1545_v37  ;;  %1045 = vmatprep.subr.bf16.mxu0 %v1634_v5  ;;  %v1698_v37 = vld [vmem:[#allocation11] sm:$0xff]   ;;  %v1652_v5 = vld [vmem:[#allocation8 + $0x110] ss:$8 sps:$4 sm:$0xff]  }
  0xb9   :  { %558 = vmatpush1.bf16.msra.mxu1 %v1547_v38  ;;  %1046 = vmatpush1.bf16.msra.mxu0 %v1636_v7  ;;  %v1699_v38 = vld [vmem:[#allocation11 + $0x48] sm:$0xff]  }
  0xba   :  { %559 = vmatprep.subr.bf16.mxu1 %v1548_v41  ;;  %1047 = vmatprep.subr.bf16.mxu0 %v1637_v9  ;;  %v1702_v41 = vld [vmem:[#allocation11 + $0x10] sm:$0xff]   ;;  %v1655_v7 = vld [vmem:[#allocation8 + $0x120] ss:$8 sps:$4 sm:$0xff]  }
  0xbb   :  { %v1658_v9 = vld [vmem:[#allocation8 + $0x130] ss:$8 sps:$4 sm:$0xff]  }
  0xbd   :  { %560 = vmatpush1.bf16.msra.mxu1 %v1550_v42  ;;  %1048 = vmatpush1.bf16.msra.mxu0 %v1639_v11  ;;  %v1703_v42 = vld [vmem:[#allocation11 + $0x58] sm:$0xff]  }
  0xbe   :  { %570 = vmatprep.subr.bf16.mxu1 %v1555_v45  ;;  %1049 = vmatprep.subr.bf16.mxu0 %v1640_v13  ;;  %v1706_v45 = vld [vmem:[#allocation11 + $0x20] sm:$0xff]   ;;  %v1664_v13 = vld [vmem:[#allocation8 + $0x150] ss:$8 sps:$4 sm:$0xff]  }
  0xbf   :  { %v1661_v11 = vld [vmem:[#allocation8 + $0x140] ss:$8 sps:$4 sm:$0xff]  }
  0xc0   :  { %562 = vmatmul.mubr.bf16.vlgmr.msra.gmra.mrb[0].mxu1 %v2050_v48 }
  0xc1   :  { %571 = vmatpush1.bf16.msra.mxu1 %v1553_v46  ;;  %602 = vmatprep.mubr.bf16.mxu1 %v2045_v14  ;;  %v1579_v14 = vld [vmem:[#allocation5 + $0x10c] ss:$16 sps:$4 sm:$0xff]  }
  0xc2   :  { %572 = vmatprep.subr.bf16.mxu1 %v1558_v49  ;;  %1050 = vmatpush1.bf16.msra.mxu0 %v1642_v15  ;;  %v1707_v46 = vld [vmem:[#allocation11 + $0x68] sm:$0xff]  }
  0xc3   :  { %1051 = vmatprep.subr.bf16.mxu0 %v1643_v31  ;;  %v1667_v15 = vld [vmem:[#allocation8 + $0x160] ss:$8 sps:$4 sm:$0xff]   ;;  %v1688_v31 = vld [vmem:[#allocation8 + $0x1d0] ss:$8 sps:$4 sm:$0xff]  }
  0xc5   :  { %573 = vmatpush1.bf16.msra.mxu1 %v1556_v52 }
  0xc6   :  { %574 = vmatprep.subr.bf16.mxu1 %v1561_v54  ;;  %1052 = vmatpush1.bf16.msra.mxu0 %v1645_v32  ;;  %v1693_v32 = vld [vmem:[#allocation8 + $0x1e4] ss:$8 sps:$4 sm:$0xff]  }
  0xc7   :  { %1053 = vmatprep.subr.bf16.mxu0 %v1646_v33 }
  0xc9   :  { %575 = vmatpush1.bf16.msra.mxu1 %v1559_v56 }
  0xca   :  { %576 = vmatprep.subr.bf16.mxu1 %v1564_v58  ;;  %1054 = vmatpush1.bf16.msra.mxu0 %v1648_v34 }
  0xcb   :  { %1064 = vmatprep.subr.bf16.mxu0 %v1651_v35  ;;  %v1691_v35 = vld [vmem:[#allocation8 + $0x1e0] ss:$8 sps:$4 sm:$0xff]  }
  0xcd   :  { %577 = vmatpush1.bf16.msra.mxu1 %v1562_v60 }
  0xce   :  { %578 = vmatprep.subr.bf16.mxu1 %v1567_v62 }
  0xd1   :  { %579 = vmatpush1.bf16.msra.mxu1 %v1565_v0 }
  0xd2   :  { %580 = vmatprep.subr.bf16.mxu1 %v1570_v2  ;;  %v1649_v2 = vld [vmem:[#allocation8 + $0x100] ss:$8 sps:$4 sm:$0xff]  }
  0xd5   :  { %581 = vmatpush1.bf16.msra.mxu1 %v1568_v4  ;;  %v1654_v4 = vld [vmem:[#allocation8 + $0x114] ss:$8 sps:$4 sm:$0xff]  }
  0xd6   :  { %582 = vmatprep.subr.bf16.mxu1 %v1573_v6  ;;  %v1657_v6 = vld [vmem:[#allocation8 + $0x124] ss:$8 sps:$4 sm:$0xff]  }
  0xd9   :  { %583 = vmatpush1.bf16.msra.mxu1 %v1571_v8  ;;  %v1660_v8 = vld [vmem:[#allocation8 + $0x134] ss:$8 sps:$4 sm:$0xff]  }
  0xda   :  { %584 = vmatprep.subr.bf16.mxu1 %v1576_v10  ;;  %v1663_v10 = vld [vmem:[#allocation8 + $0x144] ss:$8 sps:$4 sm:$0xff]  }
  0xdd   :  { %585 = vmatpush1.bf16.msra.mxu1 %v1574_v12  ;;  %v1666_v12 = vld [vmem:[#allocation8 + $0x154] ss:$8 sps:$4 sm:$0xff]  }
  0xde   :  { %586 = vmatprep.subr.bf16.mxu1 %v1579_v14  ;;  %v1669_v14 = vld [vmem:[#allocation8 + $0x164] ss:$8 sps:$4 sm:$0xff]  }
  0xe1   :  { %587 = vmatpush1.bf16.msra.mxu1 %v1577_v16  ;;  %v1672_v16 = vld [vmem:[#allocation8 + $0x174] ss:$8 sps:$4 sm:$0xff]  }
  0xe2   :  { %588 = vmatprep.subr.bf16.mxu1 %v1582_v17  ;;  %v1670_v17 = vld [vmem:[#allocation8 + $0x170] ss:$8 sps:$4 sm:$0xff]  }
  0xe5   :  { %589 = vmatpush1.bf16.msra.mxu1 %v1580_v18  ;;  %v1675_v18 = vld [vmem:[#allocation8 + $0x184] ss:$8 sps:$4 sm:$0xff]  }
  0xe6   :  { %590 = vmatprep.subr.bf16.mxu1 %v1585_v19  ;;  %v1673_v19 = vld [vmem:[#allocation8 + $0x180] ss:$8 sps:$4 sm:$0xff]  }
  0xe9   :  { %591 = vmatpush1.bf16.msra.mxu1 %v1583_v20  ;;  %v1678_v20 = vld [vmem:[#allocation8 + $0x194] ss:$8 sps:$4 sm:$0xff]  }
  0xea   :  { %592 = vmatprep.subr.bf16.mxu1 %v1588_v21  ;;  %v1676_v21 = vld [vmem:[#allocation8 + $0x190] ss:$8 sps:$4 sm:$0xff]  }
  0xed   :  { %593 = vmatpush1.bf16.msra.mxu1 %v1586_v22  ;;  %v1681_v22 = vld [vmem:[#allocation8 + $0x1a4] ss:$8 sps:$4 sm:$0xff]  }
  0xee   :  { %594 = vmatprep.subr.bf16.mxu1 %v1591_v23  ;;  %v1679_v23 = vld [vmem:[#allocation8 + $0x1a0] ss:$8 sps:$4 sm:$0xff]  }
  0xf1   :  { %595 = vmatpush1.bf16.msra.mxu1 %v1589_v24  ;;  %v1684_v24 = vld [vmem:[#allocation8 + $0x1b4] ss:$8 sps:$4 sm:$0xff]  }
  0xf2   :  { %596 = vmatprep.subr.bf16.mxu1 %v1594_v25  ;;  %v1682_v25 = vld [vmem:[#allocation8 + $0x1b0] ss:$8 sps:$4 sm:$0xff]  }
  0xf5   :  { %597 = vmatpush1.bf16.msra.mxu1 %v1592_v26  ;;  %v1687_v26 = vld [vmem:[#allocation8 + $0x1c4] ss:$8 sps:$4 sm:$0xff]  }
  0xf6   :  { %598 = vmatprep.subr.bf16.mxu1 %v1597_v27  ;;  %v1685_v27 = vld [vmem:[#allocation8 + $0x1c0] ss:$8 sps:$4 sm:$0xff]  }
  0xf9   :  { %599 = vmatpush1.bf16.msra.mxu1 %v1595_v28  ;;  %v1690_v28 = vld [vmem:[#allocation8 + $0x1d4] ss:$8 sps:$4 sm:$0xff]  }
  0xfa   :  { %600 = vmatprep.subr.bf16.mxu1 %v1600_v29 }
  0xfd   :  { %601 = vmatpush1.bf16.msra.mxu1 %v1598_v30 }
  0xfe   :  { %1461 = vmatprep.subr.bf16.mxu1 %v1697_v36 }
 0x100   :  { %603 = vmatmul.mubr.bf16.vlgmr.msra.gmra.mrb[4].mxu1 %v2050_v48  ;;  %v182_v48 = vlaneseq }
 0x101   :  { %1462 = vmatpush3.bf16.msra.mxu1 %v1698_v37  ;;  %v1696_v37 = vld [vmem:[#allocation8 + $0x1f4] ss:$8 sps:$4 sm:$0xff]  }
 0x102   :  { %1463 = vmatprep.subr.bf16.mxu1 %v1699_v38  ;;  %v2055_v49 = vshrl.u32 %v182_v48, 7 }
 0x104   :  { %v184_v50 = vsub.s32 0, %v2055_v49  ;;  %v188_v52 = vsub.s32 1, %v2055_v49  ;;  %v192_v29 = vsub.s32 2, %v2055_v49  ;;  %v196_v30 = vsub.s32 3, %v2055_v49 }
 0x105   :  { %1464 = vmatpush3.bf16.msra.mxu1 %v1700_v39 }
 0x106   :  { %1465 = vmatprep.subr.bf16.mxu1 %v1701_v40  ;;  %v185_v53 = vrot.slane %v2058_v51, %v184_v50  ;;  %v189_v54 = vrot.slane %v2058_v51, %v188_v52  ;;  %v193_v33 = vrot.slane %v2058_v51, %v192_v29  ;;  %v197_v34 = vrot.slane %v2058_v51, %v196_v30 }
 0x109   :  { %1466 = vmatpush3.bf16.msra.mxu1 %v1702_v41 }
 0x10a   :  { %1467 = vmatprep.subr.bf16.mxu1 %v1703_v42 }
 0x10d   :  { %1468 = vmatpush3.bf16.msra.mxu1 %v1704_v43 }
 0x10e   :  { %1469 = vmatprep.subr.bf16.mxu1 %v1705_v44  ;;  %v1694_v44 = vld [vmem:[#allocation8 + $0x1f0] ss:$8 sps:$4 sm:$0xff]  }
 0x111   :  { %1470 = vmatpush3.bf16.msra.mxu1 %v1706_v45 }
 0x112   :  { %1471 = vmatprep.subr.bf16.mxu1 %v1707_v46 }
 0x115   :  { %1472 = vmatpush3.bf16.msra.mxu1 %v1708_v47 }
 0x193   :  { %v563_v55 = vpop.f32.mrb[0].mxu1 }
 0x194   :  { %v564_v56 = vadd.f32 %v563_v55, %v185_v53  ;;  %v565_v57 = vpop.f32.mrb[1].mxu1  ;;  %v1709_v53 = vld [vmem:[#allocation11 + $0x70] sm:$0xff]   ;;  %v1711_v55 = vld [vmem:[#allocation11 + $0x78] sm:$0xff]  }
 0x195   :  { %v566_v58 = vadd.f32 %v565_v57, %v189_v54  ;;  %v567_v59 = vpop.f32.mrb[2].mxu1  ;;  %v1710_v54 = vld [vmem:[#allocation11 + $0x30] sm:$0xff]   ;;  %1473 = vmatprep.subr.bf16.mxu1 %v1709_v53  ;;  %v691_v57 = vld [vmem:[#allocation10] sm:$0x3] }
 0x196   :  { %vm611_vm0 = vcmp.gt.f32.partialorder %v564_v56, 0.0  ;;  %v615_v60 = vmul.f32 0.2, %v564_v56  ;;  %v568_v61 = vpop.f32.mrb[3].mxu1  ;;  %1474 = vmatpush3.bf16.msra.mxu1 %v1710_v54  ;;  %v700_v59 = vrot.slane %v691_v57, %v188_v52 }
 0x197   :  { %vm612_vm1 = vcmp.gt.f32.partialorder %v566_v58, 0.0  ;;  %v616_v62 = vmul.f32 0.2, %v566_v58  ;;  %1475 = vmatprep.subr.bf16.mxu1 %v1711_v55 }
 0x198   :  { %v619_v63 = vsel %vm611_vm0, %v564_v56, %v615_v60  ;;  %v1712_v56 = vld [vmem:[#allocation11 + $0x38] sm:$0xff]  }
 0x199   :  { %v620_v0 = vsel %vm612_vm1, %v566_v58, %v616_v62  ;;  %v623_v3 = vpack.c.bf16 %v619_v63, %v619_v63  ;;  %v696_v58 = vrot.slane %v691_v57, %v184_v50 }
 0x19a   :  { %v624_v1 = vpack.c.bf16 %v620_v0, %v620_v0  ;;  %1476 = vmatpush3.bf16.msra.mxu1 %v1712_v56 }
 0x19c   :  { %1055 = vmatprep.mubr.bf16.mxu0 %v624_v1 }
 0x19d   :  { %1056 = vmatmul.mubr.bf16.vlgmr.msra.gmra.mrb[0].mxu0 %v623_v3 }
 0x19e   :  { %1065 = vmatpush1.bf16.msra.mxu0 %v1649_v2 }
 0x19f   :  { %1066 = vmatprep.subr.bf16.mxu0 %v1654_v4 }
 0x1a2   :  { %1067 = vmatpush1.bf16.msra.mxu0 %v1652_v5 }
 0x1a3   :  { %1068 = vmatprep.subr.bf16.mxu0 %v1657_v6 }
 0x1a6   :  { %1069 = vmatpush1.bf16.msra.mxu0 %v1655_v7 }
 0x1a7   :  { %1070 = vmatprep.subr.bf16.mxu0 %v1660_v8  ;;  %v1443_v8 = vld [vmem:[#allocation13] ss:$0 sm:$0xff] }
 0x1aa   :  { %1071 = vmatpush1.bf16.msra.mxu0 %v1658_v9 }
 0x1ab   :  { %1072 = vmatprep.subr.bf16.mxu0 %v1663_v10 }
 0x1ae   :  { %1073 = vmatpush1.bf16.msra.mxu0 %v1661_v11 }
 0x1af   :  { %1074 = vmatprep.subr.bf16.mxu0 %v1666_v12 }
 0x1b2   :  { %1075 = vmatpush1.bf16.msra.mxu0 %v1664_v13 }
 0x1b3   :  { %1076 = vmatprep.subr.bf16.mxu0 %v1669_v14 }
 0x1b6   :  { %1077 = vmatpush1.bf16.msra.mxu0 %v1667_v15 }
 0x1b7   :  { %1078 = vmatprep.subr.bf16.mxu0 %v1672_v16 }
 0x1ba   :  { %1079 = vmatpush1.bf16.msra.mxu0 %v1670_v17 }
 0x1bb   :  { %1080 = vmatprep.subr.bf16.mxu0 %v1675_v18 }
 0x1be   :  { %1081 = vmatpush1.bf16.msra.mxu0 %v1673_v19 }
 0x1bf   :  { %1082 = vmatprep.subr.bf16.mxu0 %v1678_v20 }
 0x1c2   :  { %1083 = vmatpush1.bf16.msra.mxu0 %v1676_v21 }
 0x1c3   :  { %1084 = vmatprep.subr.bf16.mxu0 %v1681_v22 }
 0x1c6   :  { %1085 = vmatpush1.bf16.msra.mxu0 %v1679_v23 }
 0x1c7   :  { %1086 = vmatprep.subr.bf16.mxu0 %v1684_v24 }
 0x1ca   :  { %1087 = vmatpush1.bf16.msra.mxu0 %v1682_v25 }
 0x1cb   :  { %1088 = vmatprep.subr.bf16.mxu0 %v1687_v26 }
 0x1ce   :  { %1089 = vmatpush1.bf16.msra.mxu0 %v1685_v27 }
 0x1cf   :  { %1090 = vmatprep.subr.bf16.mxu0 %v1690_v28 }
 0x1d2   :  { %1091 = vmatpush1.bf16.msra.mxu0 %v1688_v31 }
 0x1d3   :  { %v604_v36 = vpop.f32.mrb[4].mxu1  ;;  %1092 = vmatprep.subr.bf16.mxu0 %v1693_v32 }
 0x1d4   :  { %v605_v38 = vadd.f32 %v604_v36, %v193_v33  ;;  %v606_v39 = vpop.f32.mrb[5].mxu1 }
 0x1d5   :  { %v607_v40 = vadd.f32 %v606_v39, %v197_v34  ;;  %v608_v41 = vpop.f32.mrb[6].mxu1 }
 0x1d6   :  { %vm613_vm2 = vcmp.gt.f32.partialorder %v605_v38, 0.0  ;;  %v617_v42 = vmul.f32 0.2, %v605_v38  ;;  %v609_v43 = vpop.f32.mrb[7].mxu1  ;;  %1093 = vmatpush1.bf16.msra.mxu0 %v1691_v35 }
 0x1d7   :  { %vm614_vm3 = vcmp.gt.f32.partialorder %v607_v40, 0.0  ;;  %v618_v45 = vmul.f32 0.2, %v607_v40  ;;  %1094 = vmatprep.subr.bf16.mxu0 %v1696_v37 }
 0x1d8   :  { %v621_v46 = vsel %vm613_vm2, %v605_v38, %v617_v42 }
 0x1d9   :  { %v622_v47 = vsel %vm614_vm3, %v607_v40, %v618_v45  ;;  %v625_v51 = vpack.c.bf16 %v621_v46, %v621_v46 }
 0x1da   :  { %1095 = vmatpush1.bf16.msra.mxu0 %v1694_v44  ;;  %v626_v48 = vpack.c.bf16 %v622_v47, %v622_v47 }
 0x1dc   :  { %1096 = vmatprep.mubr.bf16.mxu0 %v626_v48 }
 0x1dd   :  { %1097 = vmatmul.mubr.bf16.vlgmr.msra.gmra.mrb[0].mxu0 %v625_v51 }
 0x2b0   :  { %v1098_v60 = vpop.f32.mrb[0].mxu0 }
 0x2b1   :  { %v1483_v61 = vadd.f32 %v1098_v60, %v696_v58  ;;  %v1100_v62 = vpop.f32.mrb[1].mxu0 }
 0x2b2   :  { %v1484_v63 = vadd.f32 %v1100_v62, %v700_v59  ;;  %v1102_v0 = vpop.f32.mrb[2].mxu0 }
 0x2b3   :  { %vm1105_vm4 = vcmp.gt.f32.partialorder %v1483_v61, 0.0  ;;  %v1107_v1 = vmul.f32 0.2, %v1483_v61  ;;  %v1103_v2 = vpop.f32.mrb[3].mxu0 }
 0x2b4   :  { %vm1106_vm5 = vcmp.gt.f32.partialorder %v1484_v63, 0.0  ;;  %v1108_v3 = vmul.f32 0.2, %v1484_v63 }
 0x2b5   :  { %v1109_v4 = vsel %vm1105_vm4, %v1483_v61, %v1107_v1 }
 0x2b6   :  { %v1110_v5 = vsel %vm1106_vm5, %v1484_v63, %v1108_v3  ;;  %v1111_v7 = vpack.c.bf16 %v1109_v4, %v1109_v4 }
 0x2b7   :  { %v1112_v6 = vpack.c.bf16 %v1110_v5, %v1110_v5 }
 0x2b9   :  { %1280 = vmatprep.mubr.bf16.mxu1 %v1112_v6 }
 0x2ba   :  { %1281 = vmatmul.mubr.bf16.vlgmr.msra.gmra.mrb[8].mxu1 %v1111_v7 }
 0x38d   :  { %v1477_v50 = vpop.f32.mrb[8].mxu1 }
 0x38e   :  { %v1478_v49 = vpop.f32.mrb[9].mxu1 }
 0x38f   :  { %v1479_v52 = vadd.f32 %v1478_v49, %v1477_v50  ;;  %v1480_v9 = vpop.f32.mrb[10].mxu1 }
 0x390   :  { %v1481_v10 = vpop.f32.mrb[11].mxu1 }
 0x391   :  { %v1283_v11 = vadd.f32 %v1479_v52, %v1443_v8 }
 0x393   :  { %v1460_v12 = vmul.f32 -1.442695, %v1283_v11 }
 0x395   :  { %1713 = vpow2.f32 %v1460_v12 }
 0x39f   :  { %v1714_v13 = vpop.eup %1713 }
 0x3a0   :  { %v1291_v14 = vadd.f32 1.0, %v1714_v13 }
 0x3a2   :  { %1715 = vrcp.f32 %v1291_v14 }
 0x3ac   :  { %v1716_v15 = vpop.eup %1715 }
 0x3ad   :  { %1294 = vst [vmem:[#allocation14] sm:$0xff] %v1716_v15 }
 0x3ae   :  { %1882 = shalt.err (!%p1879_p4)
}
 0x3af   :  { %s1883_s15 = scalar_lea.hbm %s2094_s7, 128 }
 0x3b0   :  { %p1884_p5 = scmp.ne.s32.totalorder %s2094_s7, %s1883_s15  ;;  %p1887_p6 = scmp.lt.u32.totalorder %s1883_s15, %s2094_s7 }
 0x3b2   :  { %p1889_p7 = pnand %p1887_p6, %p1884_p5 }
 0x3b4   :  { %1892 = shalt.err (!%p1889_p7)
}
 0x3b5   :  { %1304 = dma.vmem_to_hbm [thread:$0]  %s1302_s13, 128, %s2094_s7, [#allocation4]  }
 0x3b6   :  { %1901 = dma.done.wait [#allocation4], 128  }
 0x3b7   :  { %1902 = vsyncadd [#allocation4], 4294967168 }
 0x3b8   :  { %1308 = vsyncpa [#allocation3], 1 }
 0x3b9   :  { %1309 = vsyncpa [#allocation6], 1 }
 0x3ba   :  { %1310 = vsyncpa [#allocation9], 1 }
 0x3bb   :  { %1311 = vsyncpa [#allocation12], 1 }
 0x3bc   :  { %1312 = vsyncpa [#allocation4], 1 }

</bundles_post_ra>
